<compile_context>
chip_gen: v6e
topology: v6e:2x2x1
jax: 0.10.0
libtpu: 0.0.40
codegen_flags: <defaults>
</compile_context>

<pallas_src>
import jax
import jax.numpy as jnp
from jax.experimental import pallas as pl
from jax.experimental.pallas import tpu as pltpu


# ---------------------------------------------------------------------------
# Small helpers
# ---------------------------------------------------------------------------

def _round_up(x, m):
    return (x + m - 1) // m * m


def _next_pow2(x):
    return 1 << max(0, int(x) - 1).bit_length()


def _choose_tm(M, pref=512, min_tm=128):
    """Power-of-two M tile: prefer `pref`, but keep >=2 grid blocks when
    possible (v7x megacore) without dropping below `min_tm`."""
    tm = pref
    while tm > min_tm and _round_up(M, tm) // tm < 2:
        tm //= 2
    return tm


def _pad_rows(x, rows):
    r = x.shape[0]
    if r == rows:
        return x
    return jnp.pad(x, ((0, rows - r), (0, 0)))


_VMEM_LIMIT_CACHE = None


def _vmem_limit_bytes():
    """~0.7x physical VMEM, capped at 96 MiB (v5e/v6e: ~90 MiB, v7x: ~45 MiB)."""
    global _VMEM_LIMIT_CACHE
    if _VMEM_LIMIT_CACHE is None:
        try:
            cap = pltpu.get_tpu_info().vmem_capacity_bytes
        except Exception:
            cap = 64 * 1024 * 1024          # conservative fallback (v7x-sized)
        _VMEM_LIMIT_CACHE = max(32 * 1024 * 1024,
                                min(96 * 1024 * 1024, int(cap * 0.7)))
    return _VMEM_LIMIT_CACHE


# ---------------------------------------------------------------------------
# Fused matmul + BN affine (+ residual | + second matmul) (+ ReLU) kernel
# ---------------------------------------------------------------------------

def _fused_matmul_kernel(relu, mode):
    def finish(out, o_ref):
        if relu:
            out = jnp.maximum(out, 0.0)
        o_ref[...] = out.astype(o_ref.dtype)

    if mode == 'plain':
        def kernel(a_ref, w_ref, s_ref, b_ref, o_ref):
            acc = jnp.dot(a_ref[...], w_ref[...],
                          preferred_element_type=jnp.float32)
            finish(acc * s_ref[...] + b_ref[...], o_ref)
    elif mode == 'residual':
        def kernel(a_ref, w_ref, s_ref, b_ref, r_ref, o_ref):
            acc = jnp.dot(a_ref[...], w_ref[...],
                          preferred_element_type=jnp.float32)
            finish(acc * s_ref[...] + b_ref[...]
                   + r_ref[...].astype(jnp.float32), o_ref)
    else:  # 'dual' : conv3 + fused downsample branch
        def kernel(a_ref, w_ref, s_ref, b_ref,
                   a2_ref, w2_ref, s2_ref, b2_ref, o_ref):
            acc1 = jnp.dot(a_ref[...], w_ref[...],
                           preferred_element_type=jnp.float32)
            acc2 = jnp.dot(a2_ref[...], w2_ref[...],
                           preferred_element_type=jnp.float32)
            finish(acc1 * s_ref[...] + b_ref[...]
                   + acc2 * s2_ref[...] + b2_ref[...], o_ref)
    return kernel


def fused_matmul(a, w, scale, shift, residual=None, second=None, relu=True,
                 out_dtype=jnp.bfloat16):
    """out = act((a @ w) * scale + shift  [+ residual | + (a2 @ w2) * s2 + b2]).

    K and N are full-extent (single block): the weights stay resident in VMEM
    and there is no K reduction axis / accumulator scratch.  The 1-D grid tiles
    M only.  A / W / residual feed the MXU in bf16; the epilogue runs in f32.
    """
    M, K = a.shape
    Kw, N = w.shape
    assert K == Kw
    assert residual is None or second is None

    tm = _choose_tm(M)
    Mp = _round_up(M, tm)

    inputs = [_pad_rows(a.astype(jnp.bfloat16), Mp),
              w.astype(jnp.bfloat16),
              scale.astype(jnp.float32).reshape(1, N),
              shift.astype(jnp.float32).reshape(1, N)]
    in_specs = [
        pl.BlockSpec((tm, K), lambda i: (i, 0)),
        pl.BlockSpec((K, N), lambda i: (0, 0)),     # resident weight
        pl.BlockSpec((1, N), lambda i: (0, 0)),
        pl.BlockSpec((1, N), lambda i: (0, 0)),
    ]
    flops = 2 * Mp * N * K
    bytes_accessed = Mp * K * 2 + K * N * 2 + Mp * N * 2 + 2 * N * 4

    if residual is not None:
        mode = 'residual'
        inputs.append(_pad_rows(residual.astype(jnp.bfloat16), Mp))
        in_specs.append(pl.BlockSpec((tm, N), lambda i: (i, 0)))
        bytes_accessed += Mp * N * 2
    elif second is not None:
        mode = 'dual'
        a2, w2, scale2, shift2 = second
        K2 = a2.shape[1]
        assert a2.shape[0] == M and w2.shape == (K2, N)
        inputs += [_pad_rows(a2.astype(jnp.bfloat16), Mp),
                   w2.astype(jnp.bfloat16),
                   scale2.astype(jnp.float32).reshape(1, N),
                   shift2.astype(jnp.float32).reshape(1, N)]
        in_specs += [
            pl.BlockSpec((tm, K2), lambda i: (i, 0)),
            pl.BlockSpec((K2, N), lambda i: (0, 0)),
            pl.BlockSpec((1, N), lambda i: (0, 0)),
            pl.BlockSpec((1, N), lambda i: (0, 0)),
        ]
        flops += 2 * Mp * N * K2
        bytes_accessed += Mp * K2 * 2 + K2 * N * 2 + 2 * N * 4
    else:
        mode = 'plain'

    out = pl.pallas_call(
        _fused_matmul_kernel(relu, mode),
        out_shape=jax.ShapeDtypeStruct((Mp, N), out_dtype),
        grid=(Mp // tm,),
        in_specs=in_specs,
        out_specs=pl.BlockSpec((tm, N), lambda i: (i, 0)),
        compiler_params=pltpu.CompilerParams(
            dimension_semantics=("parallel",),
            vmem_limit_bytes=_vmem_limit_bytes()),
        cost_estimate=pl.CostEstimate(flops=flops, transcendentals=0,
                                      bytes_accessed=bytes_accessed),
    )(*inputs)

    return out[:M] if Mp != M else out


# ---------------------------------------------------------------------------
# Fused 3x3 conv (stride 1) + BN + ReLU — no HBM im2col
# ---------------------------------------------------------------------------

def conv3x3_fused_s1(x_nhwc, w_mat, scale, shift, dilation=1,
                     out_dtype=jnp.bfloat16):
    """3x3 conv (stride 1, padding=dilation, dilation d) + folded BN + ReLU.

    The zero-padded NHWC activation is flattened to rows of the padded grid;
    each grid step loads a contiguous row tile plus a small halo tile and does
    the 9 tap matmuls on shifted windows entirely in VMEM:
        out[m] = relu( sum_t a0[m + off_t] @ W[t] * scale + shift )
    Returns ((N*OH*OW, Cout) bf16, (N, OH, OW)).
    """
    N, H, W, C = x_nhwc.shape
    d = int(dilation)
    Cout = w_mat.shape[1]
    OH, OW = H, W
    Hp, Wp = H + 2 * d, W + 2 * d
    rows_per_img = Hp * Wp
    Mtot = N * rows_per_img

    max_off = 2 * d * Wp + 2 * d                 # largest tap offset (dy=dx=2)
    TH = max(16, _next_pow2(max_off))            # halo rows (power of two)
    TM = max(_choose_tm(Mtot), TH)               # main rows per step; TH | TM
    ratio = TM // TH
    Mpad = _round_up(Mtot, TM)

    # Single pad: spatial zero-padding + enough whole zero images so the last
    # halo block [Mpad, Mpad + TH) is in bounds (no second full-array pad).
    n_imgs = -(-(Mpad + TH) // rows_per_img)
    xp = jnp.pad(x_nhwc.astype(jnp.bfloat16),
                 ((0, n_imgs - N), (d, d), (d, d), (0, 0)))
    a0 = xp.reshape(n_imgs * rows_per_img, C)

    w3d = w_mat.astype(jnp.bfloat16).reshape(9, C, Cout)
    s_row = scale.astype(jnp.float32).reshape(1, Cout)
    b_row = shift.astype(jnp.float32).reshape(1, Cout)

    # Tap offsets in the flattened padded grid (dy, dx order matches w3d rows).
    offs = tuple(dy * d * Wp + dx * d for dy in range(3) for dx in range(3))

    def kernel(a_ref, h_ref, w_ref, s_ref, b_ref, o_ref):
        rows = jnp.concatenate([a_ref[...], h_ref[...]], axis=0)   # (TM+TH, C)
        acc = jnp.zeros((TM, Cout), jnp.float32)
        for t, off in enumerate(offs):                             # unrolled taps
            acc = acc + jnp.dot(rows[off:off + TM, :], w_ref[t],
                                preferred_element_type=jnp.float32)
        out = jnp.maximum(acc * s_ref[...] + b_ref[...], 0.0)
        o_ref[...] = out.astype(o_ref.dtype)

    flops = 2 * Mpad * Cout * 9 * C
    bytes_accessed = ((Mpad + (Mpad // TM) * TH) * C * 2
                      + 9 * C * Cout * 2 + Mpad * Cout * 2 + 2 * Cout * 4)

    out = pl.pallas_call(
        kernel,
        out_shape=jax.ShapeDtypeStruct((Mpad, Cout), out_dtype),
        grid=(Mpad // TM,),
        in_specs=[
            pl.BlockSpec((TM, C), lambda i: (i, 0)),                # main rows
            pl.BlockSpec((TH, C), lambda i: ((i + 1) * ratio, 0)),  # halo rows
            pl.BlockSpec((9, C, Cout), lambda i: (0, 0, 0)),        # resident W
            pl.BlockSpec((1, Cout), lambda i: (0, 0)),
            pl.BlockSpec((1, Cout), lambda i: (0, 0)),
        ],
        out_specs=pl.BlockSpec((TM, Cout), lambda i: (i, 0)),
        compiler_params=pltpu.CompilerParams(
            dimension_semantics=("parallel",),
            vmem_limit_bytes=_vmem_limit_bytes()),
        cost_estimate=pl.CostEstimate(flops=flops, transcendentals=0,
                                      bytes_accessed=bytes_accessed),
    )(a0, a0, w3d, s_row, b_row)

    # Valid outputs live at the (n, oh, ow) positions of the padded grid.
    o = out[:Mtot].reshape(N, Hp, Wp, Cout)[:, :OH, :OW, :]
    return o.reshape(N * OH * OW, Cout), (N, OH, OW)


# ---------------------------------------------------------------------------
# im2col fallback (only used for stride > 1 3x3 conv)
# ---------------------------------------------------------------------------

def im2col(x, kh, kw, stride, padding, dilation=1):
    """NHWC -> (N*OH*OW, kh*kw*C); column order matches weight layout (i, j, c)."""
    N, H, W, C = x.shape
    OH = (H + 2 * padding - dilation * (kh - 1) - 1) // stride + 1
    OW = (W + 2 * padding - dilation * (kw - 1) - 1) // stride + 1
    xp = jnp.pad(x, ((0, 0), (padding, padding), (padding, padding), (0, 0)))
    cols = [xp[:, i * dilation: i * dilation + stride * OH: stride,
               j * dilation: j * dilation + stride * OW: stride, :]
            for i in range(kh) for j in range(kw)]
    patches = jnp.concatenate(cols, axis=-1)
    return patches.reshape(N * OH * OW, kh * kw * C), (N, OH, OW)


# ---------------------------------------------------------------------------
# Parameters (eval-mode BN folded to scale/shift) and Bottleneck forward
# ---------------------------------------------------------------------------

def _conv_weight(key, out_c, in_c, kh, kw):
    """Kaiming-normal (fan_out) init; stored in matmul form (kh*kw*in_c, out_c)."""
    fan_out = out_c * kh * kw
    std = (2.0 / fan_out) ** 0.5
    w = jax.random.normal(key, (out_c, in_c, kh, kw), jnp.float32) * std
    return jnp.transpose(w, (2, 3, 1, 0)).reshape(kh * kw * in_c, out_c)


def _bn_folded(key, c, eps=1e-5):
    """Eval-mode BatchNorm2d folded to per-channel (scale, shift)."""
    k1, k2, k3, k4 = jax.random.split(key, 4)
    gamma = 1.0 + 0.1 * jax.random.normal(k1, (c,), jnp.float32)
    beta = 0.1 * jax.random.normal(k2, (c,), jnp.float32)
    running_mean = 0.1 * jax.random.normal(k3, (c,), jnp.float32)
    running_var = jnp.abs(jax.random.normal(k4, (c,), jnp.float32)) + 0.5
    scale = gamma * jax.lax.rsqrt(running_var + eps)
    shift = beta - running_mean * scale
    return scale, shift


def make_bottleneck_params(key, inplanes, planes, stride=1, downsample=False,
                           groups=1, base_width=64, dilation=1):
    assert groups == 1, "grouped conv not implemented"
    expansion = 4
    width = int(planes * (base_width / 64.0)) * groups
    ks = jax.random.split(key, 8)
    p = {
        'stride': stride,
        'dilation': dilation,
        'w1': _conv_weight(ks[0], width, inplanes, 1, 1),
        'bn1': _bn_folded(ks[1], width),
        'w2': _conv_weight(ks[2], width, width, 3, 3),
        'bn2': _bn_folded(ks[3], width),
        'w3': _conv_weight(ks[4], planes * expansion, width, 1, 1),
        'bn3': _bn_folded(ks[5], planes * expansion),
    }
    if downsample:
        p['wd'] = _conv_weight(ks[6], planes * expansion, inplanes, 1, 1)
        p['bnd'] = _bn_folded(ks[7], planes * expansion)
    return p


def bottleneck_forward(x_nchw, p):
    """Bottleneck.forward: 1x1 -> BN -> ReLU -> 3x3 -> BN -> ReLU -> 1x1 -> BN
    -> (+ identity / downsample) -> ReLU.  Input/Output are NCHW f32."""
    x = jnp.transpose(x_nchw.astype(jnp.bfloat16), (0, 2, 3, 1))   # NCHW -> NHWC
    N, H, W, Cin = x.shape
    s, d = p['stride'], p['dilation']
    width = p['w1'].shape[1]
    out_c = p['w3'].shape[1]

    # conv1 (1x1, stride 1) + bn1 + relu
    o1 = fused_matmul(x.reshape(N * H * W, Cin), p['w1'], *p['bn1'], relu=True)
    o1 = o1.reshape(N, H, W, width)

    # conv2 (3x3, stride s, padding=d, dilation=d) + bn2 + relu
    if s == 1:
        a3, (n, oh, ow) = conv3x3_fused_s1(o1, p['w2'], *p['bn2'], dilation=d)
    else:
        a2, (n, oh, ow) = im2col(o1, 3, 3, s, d, d)
        a3 = fused_matmul(a2, p['w2'], *p['bn2'], relu=True)

    # conv3 (1x1) + bn3 + identity / fused downsample + relu
    if 'wd' in p:
        xs = x[:, ::s, ::s, :].reshape(n * oh * ow, Cin)
        o3 = fused_matmul(a3, p['w3'], *p['bn3'],
                          second=(xs, p['wd'], *p['bnd']), relu=True)
    else:
        assert s == 1 and Cin == out_c
        o3 = fused_matmul(a3, p['w3'], *p['bn3'],
                          residual=x.reshape(n * oh * ow, Cin), relu=True)

    o3 = o3.reshape(n, oh, ow, out_c)
    return jnp.transpose(o3, (0, 3, 1, 2)).astype(jnp.float32)     # NHWC -> NCHW


# ---------------------------------------------------------------------------
# Pure-JAX reference (f32) for a numerical sanity check
# ---------------------------------------------------------------------------

def _conv_ref(x, w_mat, kh, kw, in_c, stride, padding, dilation=1):
    w = w_mat.reshape(kh, kw, in_c, -1)
    return jax.lax.conv_general_dilated(
        x, w, window_strides=(stride, stride),
        padding=((padding, padding), (padding, padding)),
        rhs_dilation=(dilation, dilation),
        dimension_numbers=('NHWC', 'HWIO', 'NHWC'))


def bottleneck_ref(x_nchw, p):
    x = jnp.transpose(x_nchw, (0, 2, 3, 1)).astype(jnp.float32)
    s, d = p['stride'], p['dilation']
    Cin = x.shape[-1]
    width = p['w1'].shape[1]

    def bn(y, ss):
        return y * ss[0] + ss[1]

    o = jax.nn.relu(bn(_conv_ref(x, p['w1'], 1, 1, Cin, 1, 0), p['bn1']))
    o = jax.nn.relu(bn(_conv_ref(o, p['w2'], 3, 3, width, s, d, d), p['bn2']))
    o = bn(_conv_ref(o, p['w3'], 1, 1, width, 1, 0), p['bn3'])
    if 'wd' in p:
        ident = bn(_conv_ref(x, p['wd'], 1, 1, Cin, s, 0), p['bnd'])
    else:
        ident = x
    o = jax.nn.relu(o + ident)
    return jnp.transpose(o, (0, 3, 1, 2))


# ---------------------------------------------------------------------------

if __name__ == "__main__":
    key = jax.random.PRNGKey(0)
    kp1, kp2, kx1, kx2 = jax.random.split(key, 4)

    # Case 1: identity residual (inplanes == planes*expansion, stride=1, no downsample)
    p1 = make_bottleneck_params(kp1, inplanes=64, planes=16, stride=1, downsample=False)
    x1 = jax.random.normal(kx1, (2, 64, 16, 16), jnp.float32)      # NCHW, like PyTorch
    y1 = bottleneck_forward(x1, p1)
    jax.block_until_ready(y1)
    assert y1.shape == (2, 64, 16, 16)
    assert bool(jnp.all(jnp.isfinite(y1)))
    assert bool(jnp.all(y1 >= 0.0))
    r1 = bottleneck_ref(x1, p1)
    tol1 = 0.05 * float(jnp.max(jnp.abs(r1))) + 0.05               # bf16 operand tolerance
    assert float(jnp.max(jnp.abs(y1 - r1))) <= tol1

    # Case 2: strided block with 1x1-conv downsample fused into the conv3 kernel
    p2 = make_bottleneck_params(kp2, inplanes=32, planes=16, stride=2, downsample=True)
    x2 = jax.random.normal(kx2, (2, 32, 16, 16), jnp.float32)
    y2 = bottleneck_forward(x2, p2)
    jax.block_until_ready(y2)
    assert y2.shape == (2, 64, 8, 8)
    assert bool(jnp.all(jnp.isfinite(y2)))
    assert bool(jnp.all(y2 >= 0.0))
    r2 = bottleneck_ref(x2, p2)
    tol2 = 0.05 * float(jnp.max(jnp.abs(r2))) + 0.05
    assert float(jnp.max(jnp.abs(y2 - r2))) <= tol2

    print("KERNEL_OK")
</pallas_src>

<mosaic_0001>
module attributes {stable_mosaic.version = 11 : i64} {
  func.func @kernel(%arg0: i32, %arg1: memref<256x64xbf16, #tpu.memory_space<vmem>>, %arg2: memref<64x16xbf16, #tpu.memory_space<vmem>>, %arg3: memref<1x16xf32, #tpu.memory_space<vmem>>, %arg4: memref<1x16xf32, #tpu.memory_space<vmem>>, %arg5: memref<256x16xbf16, #tpu.memory_space<vmem>>) attributes {dimension_semantics = [#tpu.dimension_semantics<parallel>], iteration_bounds = array<i64: 2>, scalar_prefetch = 0 : i64, scratch_operands = 0 : i64, tpu.core_type = #tpu.core_type<tc>, window_params = [{transform_indices = @transform_0, window_bounds = array<i64: 256, 64>}, {pipeline_mode = #tpu.pipeline_mode<synchronous>, transform_indices = @transform_1, window_bounds = array<i64: 64, 16>}, {pipeline_mode = #tpu.pipeline_mode<synchronous>, transform_indices = @transform_2, window_bounds = array<i64: 1, 16>}, {pipeline_mode = #tpu.pipeline_mode<synchronous>, transform_indices = @transform_3, window_bounds = array<i64: 1, 16>}, {transform_indices = @transform_4, window_bounds = array<i64: 256, 16>}]} {
    %c0 = arith.constant 0 : index
    %c0_0 = arith.constant 0 : index
    %0 = vector.load %arg1[%c0, %c0_0] : memref<256x64xbf16, #tpu.memory_space<vmem>>, vector<256x64xbf16>
    %c0_1 = arith.constant 0 : index
    %c0_2 = arith.constant 0 : index
    %1 = vector.load %arg2[%c0_1, %c0_2] : memref<64x16xbf16, #tpu.memory_space<vmem>>, vector<64x16xbf16>
    %cst = arith.constant dense<0.000000e+00> : vector<256x16xf32>
    %2 = tpu.matmul %0, %1, %cst {dimension_numbers = #tpu.dot_dimension_numbers<[1], [0], [0], [1], [0, 0, 1, 1], [], []>} : vector<256x64xbf16>, vector<64x16xbf16>, vector<256x16xf32> -> vector<256x16xf32>
    %c0_3 = arith.constant 0 : index
    %c0_4 = arith.constant 0 : index
    %3 = vector.load %arg3[%c0_3, %c0_4] : memref<1x16xf32, #tpu.memory_space<vmem>>, vector<1x16xf32>
    %4 = vector.broadcast %3 : vector<1x16xf32> to vector<256x16xf32>
    %5 = arith.mulf %2, %4 : vector<256x16xf32>
    %c0_5 = arith.constant 0 : index
    %c0_6 = arith.constant 0 : index
    %6 = vector.load %arg4[%c0_5, %c0_6] : memref<1x16xf32, #tpu.memory_space<vmem>>, vector<1x16xf32>
    %7 = vector.broadcast %6 : vector<1x16xf32> to vector<256x16xf32>
    %8 = arith.addf %5, %7 : vector<256x16xf32>
    %cst_7 = arith.constant 0.000000e+00 : f32
    %9 = vector.broadcast %cst_7 : f32 to vector<256x16xf32>
    %10 = arith.maximumf %8, %9 : vector<256x16xf32>
    %11 = arith.truncf %10 : vector<256x16xf32> to vector<256x16xbf16>
    %c0_8 = arith.constant 0 : index
    %c0_9 = arith.constant 0 : index
    %12 = vector.load %arg5[%c0_8, %c0_9] : memref<256x16xbf16, #tpu.memory_space<vmem>>, vector<256x16xbf16>
    tpu.vector_store %arg5[%c0_8, %c0_9], %11 {strides = array<i32>} : memref<256x16xbf16, #tpu.memory_space<vmem>>, vector<256x16xbf16>,
    return
  }
  func.func @transform_0(%arg0: i32) -> (i32, i32) {
    %c0_i32 = arith.constant 0 : i32
    %c0_i32_0 = arith.constant 0 : i32
    return %arg0, %c0_i32 : i32, i32
  }
  func.func @transform_1(%arg0: i32) -> (i32, i32) {
    %c0_i32 = arith.constant 0 : i32
    %c0_i32_0 = arith.constant 0 : i32
    %c0_i32_1 = arith.constant 0 : i32
    return %c0_i32, %c0_i32_0 : i32, i32
  }
  func.func @transform_2(%arg0: i32) -> (i32, i32) {
    %c0_i32 = arith.constant 0 : i32
    %c0_i32_0 = arith.constant 0 : i32
    %c0_i32_1 = arith.constant 0 : i32
    return %c0_i32, %c0_i32_0 : i32, i32
  }
  func.func @transform_3(%arg0: i32) -> (i32, i32) {
    %c0_i32 = arith.constant 0 : i32
    %c0_i32_0 = arith.constant 0 : i32
    %c0_i32_1 = arith.constant 0 : i32
    return %c0_i32, %c0_i32_0 : i32, i32
  }
  func.func @transform_4(%arg0: i32) -> (i32, i32) {
    %c0_i32 = arith.constant 0 : i32
    %c0_i32_0 = arith.constant 0 : i32
    return %arg0, %c0_i32 : i32, i32
  }
}

</mosaic_0001>

<bundles_post_ra>
// kernel: tpu_custom_call.1
= control target key start
LH: loop header
LB: loop body
LE: loop exit
PB: predicated region body
PF: predicated region fallthrough
CT: control target
= control target key end

     0   :  { %s1125_s15 = smov 0   ;;  %s1335_s0 = inlined_call_operand.vmem [shape: bf16[512,64], index: 0, kind: input, shape index: {}]   ;;  %s1336_s1 = inlined_call_operand.vmem [shape: bf16[64,16], index: 1, kind: input, shape index: {}]   ;;  %s1337_s2 = inlined_call_operand.vmem [shape: f32[1,16], index: 2, kind: input, shape index: {}]   ;;  %s1338_s3 = inlined_call_operand.vmem [shape: f32[1,16], index: 3, kind: input, shape index: {}]   ;;  %s1339_s4 = inlined_call_operand.vmem [shape: bf16[512,16], index: 4, kind: output, shape index: {}]  }
   0x1 LB: > { %s883_s16 = sadd.s32 4294967295, %s1098_s15   ;;  %p887_p0 = scmp.ge.s32.totalorder %s1098_s15, 1  ;;  %s1098_s15 = sphi %s1125_s15, %s14_s15  }
   0x2   : > { %p163_p1 = scmp.lt.s32.totalorder %s1098_s15, 3 }
   0x4   : > { %p164_p2 = pnand %p887_p0, %p163_p1 }
   0x5   : > { %s888_s19 = sshll.u32 (!%p164_p2), %s883_s16, 5 }
   0x6   : > { %167 = sbr.rel (%p164_p2) target bundleno = 263 (0x107), region = 36  ;;  %p190_p3 = scmp.lt.s32.totalorder (!%p164_p2), %s888_s19, 63 }
   0xb   : > { %v1072_v0 = vld [vmem:[%s1336_s1 + $0x18] sm:$0xff]   ;;  %v1073_v1 = vld [vmem:[%s1336_s1 + $0x10] sm:$0xff]   ;;  %s1341_s19 = smov (!%p190_p3, %s888_s19), 63  ;;  %v1074_v2 = vld [vmem:[%s1336_s1 + $0x8] sm:$0xff]   ;;  %vm346_vm0 = vcmask 523264   ;;  %vm794_vm1 = vcmask 125952  }
   0xc   : > { %1016 = vmatprep.subr.bf16.mxu0 %v1072_v0  ;;  %1056 = vmatprep.subr.bf16.mxu1 %v1072_v0  ;;  %s889_s24 = sshll.u32 %s1341_s19, 2  ;;  %v1075_v3 = vld [vmem:[%s1336_s1] sm:$0xff]  }
   0xd   : > { %1017 = vmatpush3.bf16.msra.mxu0 %v1072_v0  ;;  %1060 = vmatpush3.bf16.msra.mxu1 %v1072_v0  ;;  %s1153_s29 = scalar_lea.vmem %s1335_s0, %s889_s24  ;;  %v1190_v20 = vld [vmem:[%s1337_s2] ss:$0 sm:$0xff]  ;;  %s1210_s10 = scalar_lea.vmem %s1339_s4, %s889_s24 }
   0xe   : > { %1018 = vmatprep.subr.bf16.mxu0 %v1073_v1  ;;  %1057 = vmatprep.subr.bf16.mxu1 %v1073_v1  ;;  %v1076_v4 = vld [vmem:[%s1153_s29] sm:$0xff]   ;;  %v1078_v6 = vld [vmem:[%s1153_s29 + $0x8] sm:$0xff]   ;;  %v1080_v8 = vld [vmem:[%s1153_s29 + $0x10] sm:$0xff]  }
   0xf   : > { %v1077_v5 = vld [vmem:[%s1153_s29 + $0x40] sm:$0xff]   ;;  %1024 = vmatprep.mubr.msk.bf16.mxu0 %vm346_vm0, %v1076_v4  ;;  %v1079_v7 = vld [vmem:[%s1153_s29 + $0x48] sm:$0xff]   ;;  %v1081_v9 = vld [vmem:[%s1153_s29 + $0x50] sm:$0xff]  }
  0x10   : > { %1040 = vmatprep.mubr.msk.bf16.mxu1 %vm346_vm0, %v1077_v5  ;;  %v1082_v10 = vld [vmem:[%s1153_s29 + $0x18] sm:$0xff]   ;;  %v1084_v12 = vld [vmem:[%s1153_s29 + $0x20] sm:$0xff]   ;;  %v1086_v14 = vld [vmem:[%s1153_s29 + $0x28] sm:$0xff]  }
  0x11   : > { %1019 = vmatpush3.bf16.msra.mxu0 %v1073_v1  ;;  %1061 = vmatpush3.bf16.msra.mxu1 %v1073_v1  ;;  %v1083_v11 = vld [vmem:[%s1153_s29 + $0x58] sm:$0xff]   ;;  %v1085_v13 = vld [vmem:[%s1153_s29 + $0x60] sm:$0xff]   ;;  %v1087_v15 = vld [vmem:[%s1153_s29 + $0x68] sm:$0xff]  }
  0x12   : > { %1020 = vmatprep.subr.bf16.mxu0 %v1074_v2  ;;  %1058 = vmatprep.subr.bf16.mxu1 %v1074_v2  ;;  %v1088_v16 = vld [vmem:[%s1153_s29 + $0x30] sm:$0xff]   ;;  %v1090_v18 = vld [vmem:[%s1153_s29 + $0x38] sm:$0xff]   ;;  %v1195_v22 = vld [vmem:[%s1338_s3] ss:$0 sm:$0xff] }
  0x13   : > { %v1089_v17 = vld [vmem:[%s1153_s29 + $0x70] sm:$0xff]   ;;  %v1091_v19 = vld [vmem:[%s1153_s29 + $0x78] sm:$0xff]  }
  0x15   : > { %1021 = vmatpush3.bf16.msra.mxu0 %v1074_v2  ;;  %1062 = vmatpush3.bf16.msra.mxu1 %v1074_v2 }
  0x16   : > { %1022 = vmatprep.subr.bf16.mxu0 %v1075_v3  ;;  %1059 = vmatprep.subr.bf16.mxu1 %v1075_v3 }
  0x19   : > { %1023 = vmatpush3.bf16.msra.mxu0 %v1075_v3  ;;  %1063 = vmatpush3.bf16.msra.mxu1 %v1075_v3 }
  0x1c   : > { %1025 = vmatmul.mubr.msk.bf16.vlgmr.msra.gmra.mxu0 %vm346_vm0, %v1078_v6  ;;  %1041 = vmatmul.mubr.msk.bf16.vlgmr.msra.gmra.mxu1 %vm346_vm0, %v1079_v7 }
  0x1d   : > { %1028 = vmatprep.mubr.msk.bf16.mxu0 %vm346_vm0, %v1080_v8  ;;  %1044 = vmatprep.mubr.msk.bf16.mxu1 %vm346_vm0, %v1081_v9 }
  0x24   : > { %1029 = vmatmul.mubr.msk.bf16.gmra.mxu0 %vm346_vm0, %v1082_v10  ;;  %1045 = vmatmul.mubr.msk.bf16.gmra.mxu1 %vm346_vm0, %v1083_v11 }
  0x25   : > { %1032 = vmatprep.mubr.msk.bf16.mxu0 %vm346_vm0, %v1084_v12  ;;  %1048 = vmatprep.mubr.msk.bf16.mxu1 %vm346_vm0, %v1085_v13 }
  0x2c   : > { %1033 = vmatmul.mubr.msk.bf16.gmra.mxu0 %vm346_vm0, %v1086_v14  ;;  %1049 = vmatmul.mubr.msk.bf16.gmra.mxu1 %vm346_vm0, %v1087_v15 }
  0x2d   : > { %1036 = vmatprep.mubr.msk.bf16.mxu0 %vm346_vm0, %v1088_v16  ;;  %1052 = vmatprep.mubr.msk.bf16.mxu1 %vm346_vm0, %v1089_v17 }
  0x34   : > { %1037 = vmatmul.mubr.msk.bf16.gmra.mxu0 %vm346_vm0, %v1090_v18  ;;  %1053 = vmatmul.mubr.msk.bf16.gmra.mxu1 %vm346_vm0, %v1091_v19 }
  0xdc   : > { %v1026_v21 = vpop.f32.mrf.mxu0  ;;  %v1042_v23 = vpop.f32.mrf.mxu1 }
  0xdd   : > { %v565_v24 = vmul.f32 %v1026_v21, %v1190_v20  ;;  %v581_v25 = vmul.f32 %v1042_v23, %v1190_v20 }
  0xde   : > { %v429_v26 = vpop.f32.mrf.mxu0  ;;  %v493_v27 = vpop.f32.mrf.mxu1 }
  0xdf   : > { %v604_v28 = vadd.f32 %v1195_v22, %v565_v24  ;;  %v620_v29 = vadd.f32 %v1195_v22, %v581_v25  ;;  %v563_v30 = vmul.f32 %v1190_v20, %v429_v26  ;;  %v579_v31 = vmul.f32 %v1190_v20, %v493_v27 }
  0xe0   : > { %v1027_v32 = vpop.f32.mrf.mxu0  ;;  %v1043_v33 = vpop.f32.mrf.mxu1 }
  0xe1   : > { %v636_v34 = vmax.f32 %v604_v28, 0.0  ;;  %v652_v35 = vmax.f32 %v620_v29, 0.0  ;;  %v602_v36 = vadd.f32 %v1195_v22, %v563_v30  ;;  %v618_v37 = vadd.f32 %v1195_v22, %v579_v31 }
  0xe2   : > { %v566_v38 = vmul.f32 %v1027_v32, %v1190_v20  ;;  %v582_v39 = vmul.f32 %v1043_v33, %v1190_v20  ;;  %v432_v40 = vpop.f32.mrf.mxu0  ;;  %v496_v41 = vpop.f32.mrf.mxu1 }
  0xe3   : > { %v966_v42 = vpack.c.bf16 %v636_v34, %v636_v34  ;;  %v982_v43 = vpack.c.bf16 %v652_v35, %v652_v35  ;;  %v634_v44 = vmax.f32 %v602_v36, 0.0  ;;  %v650_v45 = vmax.f32 %v618_v37, 0.0 }
  0xe4   : > { %v605_v46 = vadd.f32 %v1195_v22, %v566_v38  ;;  %v621_v47 = vadd.f32 %v1195_v22, %v582_v39  ;;  %v564_v48 = vmul.f32 %v1190_v20, %v432_v40  ;;  %v580_v49 = vmul.f32 %v1190_v20, %v496_v41  ;;  %v1030_v50 = vpop.f32.mrf.mxu0  ;;  %v1046_v51 = vpop.f32.mrf.mxu1 }
  0xe5   : > { %797 = vst.msk [vmem:[%s1210_s10 + $0x8] sm:$0xf] %vm794_vm1, %v966_v42  ;;  %813 = vst.msk [vmem:[%s1210_s10 + $0x48] sm:$0xf] %vm794_vm1, %v982_v43  ;;  %v964_v52 = vpack.c.bf16 %v634_v44, %v634_v44  ;;  %v980_v53 = vpack.c.bf16 %v650_v45, %v650_v45  ;;  %v569_v54 = vmul.f32 %v1030_v50, %v1190_v20 }
  0xe6   : > { %v585_v55 = vmul.f32 %v1046_v51, %v1190_v20  ;;  %v637_v56 = vmax.f32 %v605_v46, 0.0  ;;  %v653_v57 = vmax.f32 %v621_v47, 0.0  ;;  %v603_v58 = vadd.f32 %v1195_v22, %v564_v48  ;;  %v445_v60 = vpop.f32.mrf.mxu0  ;;  %v509_v61 = vpop.f32.mrf.mxu1 }
  0xe7   : > { %v619_v59 = vadd.f32 %v1195_v22, %v580_v49  ;;  %795 = vst.msk [vmem:[%s1210_s10] sm:$0xf] %vm794_vm1, %v964_v52  ;;  %811 = vst.msk [vmem:[%s1210_s10 + $0x40] sm:$0xf] %vm794_vm1, %v980_v53  ;;  %v608_v62 = vadd.f32 %v1195_v22, %v569_v54  ;;  %v567_v0 = vmul.f32 %v1190_v20, %v445_v60 }
  0xe8   : > { %v624_v63 = vadd.f32 %v1195_v22, %v585_v55  ;;  %v583_v1 = vmul.f32 %v1190_v20, %v509_v61  ;;  %v967_v2 = vpack.c.bf16 %v637_v56, %v637_v56  ;;  %v983_v3 = vpack.c.bf16 %v653_v57, %v653_v57  ;;  %v1031_v6 = vpop.f32.mrf.mxu0  ;;  %v1047_v7 = vpop.f32.mrf.mxu1 }
  0xe9   : > { %v635_v4 = vmax.f32 %v603_v58, 0.0  ;;  %v651_v5 = vmax.f32 %v619_v59, 0.0  ;;  %v640_v8 = vmax.f32 %v608_v62, 0.0  ;;  %v606_v10 = vadd.f32 %v1195_v22, %v567_v0 }
  0xea   : > { %v656_v9 = vmax.f32 %v624_v63, 0.0  ;;  %v622_v11 = vadd.f32 %v1195_v22, %v583_v1  ;;  %798 = vst.msk [vmem:[%s1210_s10 + $0xc] sm:$0xf] %vm794_vm1, %v967_v2  ;;  %814 = vst.msk [vmem:[%s1210_s10 + $0x4c] sm:$0xf] %vm794_vm1, %v983_v3  ;;  %v570_v14 = vmul.f32 %v1031_v6, %v1190_v20  ;;  %v586_v15 = vmul.f32 %v1047_v7, %v1190_v20  ;;  %v448_v16 = vpop.f32.mrf.mxu0  ;;  %v512_v17 = vpop.f32.mrf.mxu1 }
  0xeb   : > { %v965_v12 = vpack.c.bf16 %v635_v4, %v635_v4  ;;  %v981_v13 = vpack.c.bf16 %v651_v5, %v651_v5  ;;  %v970_v18 = vpack.c.bf16 %v640_v8, %v640_v8  ;;  %v638_v21 = vmax.f32 %v606_v10, 0.0 }
  0xec   : > { %v986_v19 = vpack.c.bf16 %v656_v9, %v656_v9  ;;  %v654_v23 = vmax.f32 %v622_v11, 0.0  ;;  %v609_v24 = vadd.f32 %v1195_v22, %v570_v14  ;;  %v625_v25 = vadd.f32 %v1195_v22, %v586_v15  ;;  %v1034_v28 = vpop.f32.mrf.mxu0  ;;  %v1050_v29 = vpop.f32.mrf.mxu1 }
  0xed   : > { %796 = vst.msk [vmem:[%s1210_s10 + $0x4] sm:$0xf] %vm794_vm1, %v965_v12  ;;  %812 = vst.msk [vmem:[%s1210_s10 + $0x44] sm:$0xf] %vm794_vm1, %v981_v13  ;;  %v568_v26 = vmul.f32 %v1190_v20, %v448_v16  ;;  %v584_v27 = vmul.f32 %v1190_v20, %v512_v17  ;;  %v968_v30 = vpack.c.bf16 %v638_v21, %v638_v21 }
  0xee   : > { %801 = vst.msk [vmem:[%s1210_s10 + $0x18] sm:$0xf] %vm794_vm1, %v970_v18  ;;  %817 = vst.msk [vmem:[%s1210_s10 + $0x58] sm:$0xf] %vm794_vm1, %v986_v19  ;;  %v984_v31 = vpack.c.bf16 %v654_v23, %v654_v23  ;;  %v573_v32 = vmul.f32 %v1034_v28, %v1190_v20  ;;  %v589_v33 = vmul.f32 %v1050_v29, %v1190_v20  ;;  %v641_v34 = vmax.f32 %v609_v24, 0.0  ;;  %v461_v38 = vpop.f32.mrf.mxu0  ;;  %v525_v39 = vpop.f32.mrf.mxu1 }
  0xef   : > { %v657_v35 = vmax.f32 %v625_v25, 0.0  ;;  %v607_v36 = vadd.f32 %v1195_v22, %v568_v26  ;;  %v623_v37 = vadd.f32 %v1195_v22, %v584_v27  ;;  %799 = vst.msk [vmem:[%s1210_s10 + $0x10] sm:$0xf] %vm794_vm1, %v968_v30  ;;  %v571_v42 = vmul.f32 %v1190_v20, %v461_v38 }
  0xf0   : > { %815 = vst.msk [vmem:[%s1210_s10 + $0x50] sm:$0xf] %vm794_vm1, %v984_v31  ;;  %v612_v40 = vadd.f32 %v1195_v22, %v573_v32  ;;  %v628_v41 = vadd.f32 %v1195_v22, %v589_v33  ;;  %v587_v43 = vmul.f32 %v1190_v20, %v525_v39  ;;  %v971_v44 = vpack.c.bf16 %v641_v34, %v641_v34  ;;  %v1035_v48 = vpop.f32.mrf.mxu0  ;;  %v1051_v49 = vpop.f32.mrf.mxu1 }
  0xf1   : > { %v987_v45 = vpack.c.bf16 %v657_v35, %v657_v35  ;;  %v639_v46 = vmax.f32 %v607_v36, 0.0  ;;  %v655_v47 = vmax.f32 %v623_v37, 0.0  ;;  %v610_v52 = vadd.f32 %v1195_v22, %v571_v42 }
  0xf2   : > { %v644_v50 = vmax.f32 %v612_v40, 0.0  ;;  %v660_v51 = vmax.f32 %v628_v41, 0.0  ;;  %v626_v53 = vadd.f32 %v1195_v22, %v587_v43  ;;  %802 = vst.msk [vmem:[%s1210_s10 + $0x1c] sm:$0xf] %vm794_vm1, %v971_v44  ;;  %v574_v56 = vmul.f32 %v1035_v48, %v1190_v20  ;;  %v464_v58 = vpop.f32.mrf.mxu0  ;;  %v528_v59 = vpop.f32.mrf.mxu1 }
  0xf3   : > { %818 = vst.msk [vmem:[%s1210_s10 + $0x5c] sm:$0xf] %vm794_vm1, %v987_v45  ;;  %v969_v54 = vpack.c.bf16 %v639_v46, %v639_v46  ;;  %v985_v55 = vpack.c.bf16 %v655_v47, %v655_v47  ;;  %v590_v57 = vmul.f32 %v1051_v49, %v1190_v20  ;;  %v642_v62 = vmax.f32 %v610_v52, 0.0 }
  0xf4   : > { %v974_v60 = vpack.c.bf16 %v644_v50, %v644_v50  ;;  %v990_v61 = vpack.c.bf16 %v660_v51, %v660_v51  ;;  %v658_v63 = vmax.f32 %v626_v53, 0.0  ;;  %v613_v0 = vadd.f32 %v1195_v22, %v574_v56  ;;  %v1038_v4 = vpop.f32.mrf.mxu0  ;;  %v1054_v5 = vpop.f32.mrf.mxu1 }
  0xf5   : > { %800 = vst.msk [vmem:[%s1210_s10 + $0x14] sm:$0xf] %vm794_vm1, %v969_v54  ;;  %816 = vst.msk [vmem:[%s1210_s10 + $0x54] sm:$0xf] %vm794_vm1, %v985_v55  ;;  %v629_v1 = vadd.f32 %v1195_v22, %v590_v57  ;;  %v572_v2 = vmul.f32 %v1190_v20, %v464_v58  ;;  %v588_v3 = vmul.f32 %v1190_v20, %v528_v59 }
  0xf6   : > { %805 = vst.msk [vmem:[%s1210_s10 + $0x28] sm:$0xf] %vm794_vm1, %v974_v60  ;;  %821 = vst.msk [vmem:[%s1210_s10 + $0x68] sm:$0xf] %vm794_vm1, %v990_v61  ;;  %v972_v6 = vpack.c.bf16 %v642_v62, %v642_v62  ;;  %v988_v7 = vpack.c.bf16 %v658_v63, %v658_v63  ;;  %v577_v8 = vmul.f32 %v1038_v4, %v1190_v20  ;;  %v645_v10 = vmax.f32 %v613_v0, 0.0  ;;  %v477_v14 = vpop.f32.mrf.mxu0  ;;  %v541_v15 = vpop.f32.mrf.mxu1 }
  0xf7   : > { %v593_v9 = vmul.f32 %v1054_v5, %v1190_v20  ;;  %v661_v11 = vmax.f32 %v629_v1, 0.0  ;;  %v611_v12 = vadd.f32 %v1195_v22, %v572_v2  ;;  %v627_v13 = vadd.f32 %v1195_v22, %v588_v3 }
  0xf8   : > { %803 = vst.msk [vmem:[%s1210_s10 + $0x20] sm:$0xf] %vm794_vm1, %v972_v6  ;;  %819 = vst.msk [vmem:[%s1210_s10 + $0x60] sm:$0xf] %vm794_vm1, %v988_v7  ;;  %v616_v16 = vadd.f32 %v1195_v22, %v577_v8  ;;  %v575_v18 = vmul.f32 %v1190_v20, %v477_v14  ;;  %v591_v19 = vmul.f32 %v1190_v20, %v541_v15  ;;  %v1039_v26 = vpop.f32.mrf.mxu0  ;;  %v1055_v27 = vpop.f32.mrf.mxu1 }
  0xf9   : > { %v632_v17 = vadd.f32 %v1195_v22, %v593_v9  ;;  %v975_v21 = vpack.c.bf16 %v645_v10, %v645_v10  ;;  %v991_v23 = vpack.c.bf16 %v661_v11, %v661_v11  ;;  %v643_v24 = vmax.f32 %v611_v12, 0.0 }
  0xfa   : > { %v659_v25 = vmax.f32 %v627_v13, 0.0  ;;  %v648_v28 = vmax.f32 %v616_v16, 0.0  ;;  %v614_v30 = vadd.f32 %v1195_v22, %v575_v18  ;;  %v630_v31 = vadd.f32 %v1195_v22, %v591_v19  ;;  %v480_v36 = vpop.f32.mrf.mxu0  ;;  %v544_v37 = vpop.f32.mrf.mxu1 }
  0xfb   : > { %v664_v29 = vmax.f32 %v632_v17, 0.0  ;;  %806 = vst.msk [vmem:[%s1210_s10 + $0x2c] sm:$0xf] %vm794_vm1, %v975_v21  ;;  %822 = vst.msk [vmem:[%s1210_s10 + $0x6c] sm:$0xf] %vm794_vm1, %v991_v23  ;;  %v973_v32 = vpack.c.bf16 %v643_v24, %v643_v24  ;;  %v578_v34 = vmul.f32 %v1039_v26, %v1190_v20  ;;  %v594_v35 = vmul.f32 %v1055_v27, %v1190_v20 }
  0xfc   : > { %v989_v33 = vpack.c.bf16 %v659_v25, %v659_v25  ;;  %v978_v38 = vpack.c.bf16 %v648_v28, %v648_v28  ;;  %v646_v40 = vmax.f32 %v614_v30, 0.0  ;;  %v662_v41 = vmax.f32 %v630_v31, 0.0 }
  0xfd   : > { %v994_v39 = vpack.c.bf16 %v664_v29, %v664_v29  ;;  %804 = vst.msk [vmem:[%s1210_s10 + $0x24] sm:$0xf] %vm794_vm1, %v973_v32  ;;  %v617_v42 = vadd.f32 %v1195_v22, %v578_v34  ;;  %v633_v43 = vadd.f32 %v1195_v22, %v594_v35  ;;  %v576_v44 = vmul.f32 %v1190_v20, %v480_v36 }
  0xfe   : > { %820 = vst.msk [vmem:[%s1210_s10 + $0x64] sm:$0xf] %vm794_vm1, %v989_v33  ;;  %v592_v45 = vmul.f32 %v1190_v20, %v544_v37  ;;  %809 = vst.msk [vmem:[%s1210_s10 + $0x38] sm:$0xf] %vm794_vm1, %v978_v38  ;;  %v976_v46 = vpack.c.bf16 %v646_v40, %v646_v40  ;;  %v992_v47 = vpack.c.bf16 %v662_v41, %v662_v41 }
  0xff   : > { %825 = vst.msk [vmem:[%s1210_s10 + $0x78] sm:$0xf] %vm794_vm1, %v994_v39  ;;  %v649_v48 = vmax.f32 %v617_v42, 0.0  ;;  %v665_v49 = vmax.f32 %v633_v43, 0.0  ;;  %v615_v50 = vadd.f32 %v1195_v22, %v576_v44 }
 0x100   : > { %v631_v51 = vadd.f32 %v1195_v22, %v592_v45  ;;  %807 = vst.msk [vmem:[%s1210_s10 + $0x30] sm:$0xf] %vm794_vm1, %v976_v46  ;;  %823 = vst.msk [vmem:[%s1210_s10 + $0x70] sm:$0xf] %vm794_vm1, %v992_v47 }
 0x101   : > { %v979_v20 = vpack.c.bf16 %v649_v48, %v649_v48  ;;  %v995_v52 = vpack.c.bf16 %v665_v49, %v665_v49  ;;  %v647_v53 = vmax.f32 %v615_v50, 0.0 }
 0x102   : > { %v663_v54 = vmax.f32 %v631_v51, 0.0 }
 0x103   : > { %810 = vst.msk [vmem:[%s1210_s10 + $0x3c] sm:$0xf] %vm794_vm1, %v979_v20  ;;  %826 = vst.msk [vmem:[%s1210_s10 + $0x7c] sm:$0xf] %vm794_vm1, %v995_v52  ;;  %v977_v55 = vpack.c.bf16 %v647_v53, %v647_v53 }
 0x104   : > { %v993_v56 = vpack.c.bf16 %v663_v54, %v663_v54 }
 0x105   : > { %808 = vst.msk [vmem:[%s1210_s10 + $0x34] sm:$0xf] %vm794_vm1, %v977_v55 }
 0x106   : > { %824 = vst.msk [vmem:[%s1210_s10 + $0x74] sm:$0xf] %vm794_vm1, %v993_v56 }
 0x107 PF: > { %s14_s15 = sadd.s32 1, %s1098_s15  }
 0x108   : > { %p11_p4 = scmp.ge.s32.totalorder %s14_s15, 4  }
 0x10a   :  { %13 = sbr.rel (!%p11_p4) target bundleno = 1 (0x1), region = 66 }

</bundles_post_ra>
